<compile_context>
chip_gen: v7x
topology: tpu7x:2x2x1
jax: 0.10.0
libtpu: 0.0.40
codegen_flags: <defaults>
</compile_context>

<pallas_src>
import functools
import math

import jax
import jax.numpy as jnp
from jax.experimental import pallas as pl
from jax.experimental.pallas import tpu as pltpu


# ---------------------------- helpers ----------------------------

def _round_up(x, m):
    return ((x + m - 1) // m) * m


def _pick_tiles(m):
    """Row tile TM (multiple of 8) and padded row count Mp.

    Small inputs -> one block.  Larger inputs -> tiles up to 512 rows, chosen
    so the 'parallel' row grid has >= 2 steps (lets v7x shard across 2 TCs
    while amortizing per-step grid overhead)."""
    mp8 = _round_up(max(m, 1), 8)
    if mp8 <= 256:
        tm = mp8
    else:
        tm = min(512, _round_up((mp8 + 1) // 2, 8))
    mp = _round_up(mp8, tm)
    return tm, mp


def _pad_rows(x, rows, dtype):
    x = x.astype(dtype)
    m = x.shape[0]
    if m == rows:
        return x
    return jnp.pad(x, ((0, rows - m), (0, 0)))


def _vmem_limit(blocks):
    """Per-call VMEM request: double-buffered block bytes + slack."""
    total = 0
    for shape, dtype in blocks:
        total += int(math.prod(shape)) * jnp.dtype(dtype).itemsize
    return int(min(100 * 2 ** 20, 2 * total + 8 * 2 ** 20))


def _compiler_params(blocks):
    return pltpu.CompilerParams(dimension_semantics=("parallel",),
                                vmem_limit_bytes=_vmem_limit(blocks))


# ---------------------------- Pallas kernels ----------------------------

def _linear_kernel(x_ref, w_ref, b_ref, o_ref, *, activation):
    acc = jnp.dot(x_ref[...].astype(jnp.bfloat16), w_ref[...],
                  preferred_element_type=jnp.float32) + b_ref[...]
    if activation == "leaky_relu":
        acc = jnp.where(acc >= 0, acc, 0.01 * acc)
    o_ref[...] = acc


def _dual_linear_kernel(a_ref, c_ref, wa_ref, wc_ref, b_ref, o_ref):
    # o = a @ Wa + c @ Wc + b  (fused "concat then matmul", no concat in HBM)
    acc = jnp.dot(a_ref[...].astype(jnp.bfloat16), wa_ref[...],
                  preferred_element_type=jnp.float32)
    acc = acc + jnp.dot(c_ref[...].astype(jnp.bfloat16), wc_ref[...],
                        preferred_element_type=jnp.float32)
    o_ref[...] = acc + b_ref[...]


def _linear_scale_shift_kernel(x_ref, w_ref, b_ref, res_ref, scale_ref, shift_ref, o_ref):
    # o = res + (x @ W + b) * scale + shift   (post-attention linear + epilogue)
    l_h = jnp.dot(x_ref[...].astype(jnp.bfloat16), w_ref[...],
                  preferred_element_type=jnp.float32) + b_ref[...]
    o_ref[...] = res_ref[...] + l_h * scale_ref[...] + shift_ref[...]


def _mlp_kernel(*refs, n_layers, prenorm, residual):
    x = refs[0][...]
    o_ref = refs[-1]
    off = 1
    if prenorm:
        h = (x - refs[1][...]) * refs[2][...]
        off = 3
    else:
        h = x
    for i in range(n_layers):
        w = refs[off + 2 * i][...]
        b = refs[off + 2 * i + 1][...]
        h = jnp.dot(h.astype(jnp.bfloat16), w,
                    preferred_element_type=jnp.float32) + b
        if i < n_layers - 1:
            h = jnp.where(h >= 0, h, 0.01 * h)
    if residual:
        h = h + x.astype(jnp.float32)
    o_ref[...] = h


def _normalize_kernel(x_ref, mean_ref, rstd_ref, o_ref):
    o_ref[...] = (x_ref[...] - mean_ref[...]) * rstd_ref[...]


# ---------------------------- Pallas wrappers ----------------------------

def pallas_linear(x, p, activation=None, x_dtype=jnp.bfloat16):
    """y = act(x @ W + b); W stored bf16 at natural shape, bias f32."""
    m = x.shape[0]
    k, n = p["w"].shape
    tm, mp = _pick_tiles(m)
    xp = _pad_rows(x, mp, x_dtype)
    blocks = [((tm, k), x_dtype), ((k, n), jnp.bfloat16),
              ((1, n), jnp.float32), ((tm, n), jnp.float32)]
    out = pl.pallas_call(
        functools.partial(_linear_kernel, activation=activation),
        out_shape=jax.ShapeDtypeStruct((mp, n), jnp.float32),
        grid=(mp // tm,),
        in_specs=[pl.BlockSpec((tm, k), lambda i: (i, 0)),
                  pl.BlockSpec((k, n), lambda i: (0, 0)),
                  pl.BlockSpec((1, n), lambda i: (0, 0))],
        out_specs=pl.BlockSpec((tm, n), lambda i: (i, 0)),
        compiler_params=_compiler_params(blocks),
        cost_estimate=pl.CostEstimate(
            flops=int(2 * mp * k * n), transcendentals=0,
            bytes_accessed=int(mp * k * jnp.dtype(x_dtype).itemsize
                               + k * n * 2 + n * 4 + mp * n * 4)),
    )(xp, p["w"], p["b"])
    return out if mp == m else out[:m]


def pallas_dual_linear(a, c, p):
    """y = a @ Wa + c @ Wc + b  (fused q|k|v|skip projection of cat([a, c]))."""
    m = a.shape[0]
    ka, n = p["w_a"].shape
    kc = p["w_b"].shape[0]
    tm, mp = _pick_tiles(m)
    ap = _pad_rows(a, mp, jnp.bfloat16)
    cp = _pad_rows(c, mp, jnp.bfloat16)
    blocks = [((tm, ka), jnp.bfloat16), ((tm, kc), jnp.bfloat16),
              ((ka, n), jnp.bfloat16), ((kc, n), jnp.bfloat16),
              ((1, n), jnp.float32), ((tm, n), jnp.float32)]
    out = pl.pallas_call(
        _dual_linear_kernel,
        out_shape=jax.ShapeDtypeStruct((mp, n), jnp.float32),
        grid=(mp // tm,),
        in_specs=[pl.BlockSpec((tm, ka), lambda i: (i, 0)),
                  pl.BlockSpec((tm, kc), lambda i: (i, 0)),
                  pl.BlockSpec((ka, n), lambda i: (0, 0)),
                  pl.BlockSpec((kc, n), lambda i: (0, 0)),
                  pl.BlockSpec((1, n), lambda i: (0, 0))],
        out_specs=pl.BlockSpec((tm, n), lambda i: (i, 0)),
        compiler_params=_compiler_params(blocks),
        cost_estimate=pl.CostEstimate(
            flops=int(2 * mp * (ka + kc) * n), transcendentals=0,
            bytes_accessed=int(mp * (ka + kc) * 2 + (ka + kc) * n * 2
                               + n * 4 + mp * n * 4)),
    )(ap, cp, p["w_a"], p["w_b"], p["b"])
    return out if mp == m else out[:m]


def pallas_linear_scale_shift(x, p, resid, scale, shift):
    """o = resid + (x @ W + b) * scale + shift, fused in one pallas_call."""
    m = x.shape[0]
    k, n = p["w"].shape
    tm, mp = _pick_tiles(m)
    xp = _pad_rows(x, mp, jnp.bfloat16)
    rp = _pad_rows(resid, mp, jnp.float32)
    sp = _pad_rows(scale, mp, jnp.float32)
    hp = _pad_rows(shift, mp, jnp.float32)
    blocks = ([((tm, k), jnp.bfloat16), ((k, n), jnp.bfloat16), ((1, n), jnp.float32)]
              + [((tm, n), jnp.float32)] * 4)
    out = pl.pallas_call(
        _linear_scale_shift_kernel,
        out_shape=jax.ShapeDtypeStruct((mp, n), jnp.float32),
        grid=(mp // tm,),
        in_specs=[pl.BlockSpec((tm, k), lambda i: (i, 0)),
                  pl.BlockSpec((k, n), lambda i: (0, 0)),
                  pl.BlockSpec((1, n), lambda i: (0, 0)),
                  pl.BlockSpec((tm, n), lambda i: (i, 0)),
                  pl.BlockSpec((tm, n), lambda i: (i, 0)),
                  pl.BlockSpec((tm, n), lambda i: (i, 0))],
        out_specs=pl.BlockSpec((tm, n), lambda i: (i, 0)),
        compiler_params=_compiler_params(blocks),
        cost_estimate=pl.CostEstimate(
            flops=int(2 * mp * k * n + 3 * mp * n), transcendentals=0,
            bytes_accessed=int(mp * k * 2 + k * n * 2 + n * 4 + 5 * mp * n * 4)),
    )(xp, p["w"], p["b"], rp, sp, hp)
    return out if mp == m else out[:m]


def pallas_mlp(x, layers, mean=None, rstd=None, residual=False):
    """Fused MLP chain (LeakyReLU between layers), optional fused pre-LayerNorm
    normalize and fused residual add, in one pallas_call."""
    m = x.shape[0]
    k0 = layers[0]["w"].shape[0]
    n_out = layers[-1]["w"].shape[1]
    tm, mp = _pick_tiles(m)
    prenorm = mean is not None
    # Residual / prenorm paths keep the f32 stream; pure-matmul inputs go bf16.
    x_dtype = jnp.float32 if (prenorm or residual) else jnp.bfloat16
    xp = _pad_rows(x, mp, x_dtype)

    inputs = [xp]
    in_specs = [pl.BlockSpec((tm, k0), lambda i: (i, 0))]
    blocks = [((tm, k0), x_dtype), ((tm, n_out), jnp.float32)]
    flops = 0
    bytes_accessed = mp * k0 * jnp.dtype(x_dtype).itemsize + mp * n_out * 4
    if prenorm:
        inputs += [_pad_rows(mean, mp, jnp.float32), _pad_rows(rstd, mp, jnp.float32)]
        in_specs += [pl.BlockSpec((tm, 1), lambda i: (i, 0))] * 2
        blocks += [((tm, 1), jnp.float32)] * 2
        bytes_accessed += 2 * mp * 4
    for lyr in layers:
        k_, n_ = lyr["w"].shape
        inputs += [lyr["w"], lyr["b"]]
        in_specs += [pl.BlockSpec((k_, n_), lambda i: (0, 0)),
                     pl.BlockSpec((1, n_), lambda i: (0, 0))]
        blocks += [((k_, n_), jnp.bfloat16), ((1, n_), jnp.float32)]
        flops += 2 * mp * k_ * n_
        bytes_accessed += k_ * n_ * 2 + n_ * 4

    out = pl.pallas_call(
        functools.partial(_mlp_kernel, n_layers=len(layers),
                          prenorm=prenorm, residual=residual),
        out_shape=jax.ShapeDtypeStruct((mp, n_out), jnp.float32),
        grid=(mp // tm,),
        in_specs=in_specs,
        out_specs=pl.BlockSpec((tm, n_out), lambda i: (i, 0)),
        compiler_params=_compiler_params(blocks),
        cost_estimate=pl.CostEstimate(flops=int(flops), transcendentals=0,
                                      bytes_accessed=int(bytes_accessed)),
    )(*inputs)
    return out if mp == m else out[:m]


def pallas_graph_norm(x, mean_n, rstd_n):
    """Elementwise (x - mean) * rstd, tiled over rows."""
    m, f = x.shape
    tm, mp = _pick_tiles(m)
    blocks = [((tm, f), jnp.float32), ((tm, 1), jnp.float32),
              ((tm, 1), jnp.float32), ((tm, f), jnp.float32)]
    out = pl.pallas_call(
        _normalize_kernel,
        out_shape=jax.ShapeDtypeStruct((mp, f), jnp.float32),
        grid=(mp // tm,),
        in_specs=[pl.BlockSpec((tm, f), lambda i: (i, 0)),
                  pl.BlockSpec((tm, 1), lambda i: (i, 0)),
                  pl.BlockSpec((tm, 1), lambda i: (i, 0))],
        out_specs=pl.BlockSpec((tm, f), lambda i: (i, 0)),
        compiler_params=_compiler_params(blocks),
    )(_pad_rows(x, mp, jnp.float32), _pad_rows(mean_n, mp, jnp.float32),
      _pad_rows(rstd_n, mp, jnp.float32))
    return out if mp == m else out[:m]


def graph_ln_stats(x, batch, counts, num_graphs, eps=1e-5):
    """Per-node mean / rstd for torch_geometric LayerNorm(mode='graph',
    affine=False). Shifted two-pass variance for numerical robustness."""
    f = x.shape[1]
    norm = jnp.maximum(counts, 1.0) * f
    s1 = jax.ops.segment_sum(jnp.sum(x, axis=-1), batch, num_segments=num_graphs)
    mean = s1 / norm
    d = x - mean[batch][:, None]
    s2 = jax.ops.segment_sum(jnp.sum(d * d, axis=-1), batch, num_segments=num_graphs)
    var = s2 / norm
    rstd = jax.lax.rsqrt(var + eps)
    return mean[batch][:, None], rstd[batch][:, None]


# -------------------------- parameters ---------------------------

def _kaiming(key, n_in, n_out):
    # kaiming_uniform(fan_in, leaky_relu a=0.01)
    gain = math.sqrt(2.0 / (1.0 + 0.01 ** 2))
    bound = gain * math.sqrt(3.0 / n_in)
    return jax.random.uniform(key, (n_in, n_out), jnp.float32, -bound, bound)


def _pack_linear(w, b=None):
    """Weights stored bf16 at natural shape, bias f32 as (1, n)."""
    k, n = w.shape
    if b is None:
        b = jnp.zeros((n,), jnp.float32)
    return dict(w=w.astype(jnp.bfloat16), b=b.reshape(1, n).astype(jnp.float32))


def init_linear_params(key, n_in, n_out):
    return _pack_linear(_kaiming(key, n_in, n_out))


def init_mlp_params(key, n_in, n_hid, n_out, n_layer):
    dims = [n_in] + [n_hid] * n_layer + [n_out]
    keys = jax.random.split(key, len(dims) - 1)
    return [init_linear_params(k, dims[i], dims[i + 1]) for i, k in enumerate(keys)]


def init_layer_params(key, num_emb, num_heads):
    n_att = num_emb * num_heads  # concat=True
    kk = jax.random.split(key, 9)
    # fused q|k|v|skip projection of cat([o_norm, agg]); split into the o_norm
    # half (rows :num_emb) and the agg half (rows num_emb:) for the dual kernel.
    qkvs_w = jnp.concatenate([_kaiming(kk[i], 2 * num_emb, n_att) for i in range(1, 5)], axis=1)
    qkvs = dict(w_a=qkvs_w[:num_emb].astype(jnp.bfloat16),
                w_b=qkvs_w[num_emb:].astype(jnp.bfloat16),
                b=jnp.zeros((1, 4 * n_att), jnp.float32))
    return dict(
        gen_mlp=init_linear_params(kk[0], num_emb, num_emb),
        qkvs=qkvs,
        lin_edge=init_linear_params(kk[5], num_emb, n_att),  # PyG bias=False -> bias 0
        linear=init_linear_params(kk[6], n_att, num_emb),
        ff=init_mlp_params(kk[7], num_emb, num_emb * 4, num_emb, 1),
        cscale=init_linear_params(kk[8], num_emb, num_emb * 2),
    )


def init_graph_transformer_params(key, x_dim, e_dim, g_dim, num_emb, num_layers, num_heads):
    k = jax.random.split(key, 3 + num_layers)
    layers = [init_layer_params(k[3 + li], num_emb, num_heads) for li in range(num_layers)]
    return dict(
        x2h=init_mlp_params(k[0], x_dim, num_emb, num_emb, 2),
        e2h=init_mlp_params(k[1], e_dim, num_emb, num_emb, 2),
        c2h=init_mlp_params(k[2], max(1, g_dim), num_emb, num_emb, 2),
        layers=layers,
        # Loop-invariant per-layer linears batched along N -> one wide matmul each.
        cscale_all=dict(
            w=jnp.concatenate([l["cscale"]["w"] for l in layers], axis=1),
            b=jnp.concatenate([l["cscale"]["b"] for l in layers], axis=1)),
        lin_edge_all=dict(
            w=jnp.concatenate([l["lin_edge"]["w"] for l in layers], axis=1),
            b=jnp.concatenate([l["lin_edge"]["b"] for l in layers], axis=1)),
    )


# -------------------------- forward pass ---------------------------

def graph_transformer_forward(params, node_x, edge_attr, cond, edge_index, batch,
                              num_graphs, num_emb, num_heads):
    """Pre-LN GraphTransformer forward (ln_type='pre', num_noise=0, concat=True)."""
    o = pallas_mlp(node_x, params["x2h"])
    e = pallas_mlp(edge_attr, params["e2h"])
    c = pallas_mlp(cond, params["c2h"])

    n_nodes = node_x.shape[0]
    g = num_graphs
    n_aug = n_nodes + g
    n_att = num_emb * num_heads

    # ---- build augmented graph (virtual node per graph) ----
    u = jnp.arange(n_nodes, dtype=jnp.int32)
    v = batch + n_nodes
    aug_ei = jnp.concatenate([edge_index, jnp.stack([u, v]), jnp.stack([v, u])], axis=1)
    e_p = jnp.zeros((2 * n_nodes, num_emb), jnp.float32).at[:, 0].set(1.0)
    aug_e = jnp.concatenate([e, e_p], axis=0)

    # add_self_loops(..., fill_value='mean'): self-loop attr = mean of incoming edge attrs
    dst0 = aug_ei[1]
    loop_sum = jax.ops.segment_sum(aug_e, dst0, num_segments=n_aug)
    deg = jax.ops.segment_sum(jnp.ones((aug_e.shape[0],), jnp.float32), dst0, num_segments=n_aug)
    loop_attr = loop_sum / jnp.maximum(deg, 1.0)[:, None]
    loop_idx = jnp.arange(n_aug, dtype=jnp.int32)
    aug_ei = jnp.concatenate([aug_ei, jnp.stack([loop_idx, loop_idx])], axis=1)
    aug_e = jnp.concatenate([aug_e, loop_attr], axis=0)

    aug_batch = jnp.concatenate([batch, jnp.arange(g, dtype=jnp.int32)], axis=0)
    o = jnp.concatenate([o, c], axis=0)

    src, dst = aug_ei[0], aug_ei[1]
    counts = jax.ops.segment_sum(jnp.ones((n_aug,), jnp.float32), aug_batch, num_segments=g)
    inv_sqrt_c = 1.0 / math.sqrt(float(num_emb))

    # ---- loop-invariant matmuls, hoisted and batched across all layers ----
    all_cs = pallas_linear(c, params["cscale_all"])            # (G, L*2*num_emb)
    all_cs_n = all_cs[aug_batch]                               # gather once, slice per layer
    all_emat = pallas_linear(aug_e, params["lin_edge_all"])    # (E, L*n_att)

    for li, layer in enumerate(params["layers"]):
        cs = all_cs_n[:, li * 2 * num_emb:(li + 1) * 2 * num_emb]
        scale, shift = cs[:, :num_emb], cs[:, num_emb:]
        emat = all_emat[:, li * n_att:(li + 1) * n_att].reshape(-1, num_heads, num_emb)

        # --- pre-LN branch ---
        mean1, rstd1 = graph_ln_stats(o, aug_batch, counts, g)
        o_norm = pallas_graph_norm(o, mean1, rstd1)

        # GENConv(num_emb, num_emb, num_layers=1, aggr='add', norm=None)
        msg = jnp.maximum(o_norm[src] + aug_e, 0.0) + 1e-7
        agg = jax.ops.segment_sum(msg, dst, num_segments=n_aug) + o_norm
        agg = pallas_linear(agg, layer["gen_mlp"])

        # TransformerConv(2*num_emb, num_emb, heads, edge_dim=num_emb)
        # fused q|k|v|skip projection of cat([o_norm, agg]) without the concat.
        qkvs = pallas_dual_linear(o_norm, agg, layer["qkvs"])   # (n_aug, 4*n_att)
        q = qkvs[:, 0 * n_att:1 * n_att].reshape(n_aug, num_heads, num_emb)
        kmat = qkvs[:, 1 * n_att:2 * n_att].reshape(n_aug, num_heads, num_emb)
        vmat = qkvs[:, 2 * n_att:3 * n_att].reshape(n_aug, num_heads, num_emb)
        skip = qkvs[:, 3 * n_att:4 * n_att]

        key_j = kmat[src] + emat
        alpha = jnp.sum(q[dst] * key_j, axis=-1) * inv_sqrt_c   # (E, H)
        amax = jax.ops.segment_max(alpha, dst, num_segments=n_aug)[dst]
        ex = jnp.exp(alpha - amax)
        denom = jax.ops.segment_sum(ex, dst, num_segments=n_aug)[dst] + 1e-16
        alpha = ex / denom
        msg_t = (vmat[src] + emat) * alpha[:, :, None]
        attn = jax.ops.segment_sum(msg_t, dst, num_segments=n_aug).reshape(n_aug, n_att)
        attn = attn + skip

        # fused: o = o + linear(attn) * scale + shift
        o = pallas_linear_scale_shift(attn, layer["linear"], o, scale, shift)

        # norm2 + ff + residual fused in one pallas_call.
        mean2, rstd2 = graph_ln_stats(o, aug_batch, counts, g)
        o = pallas_mlp(o, layer["ff"], mean=mean2, rstd=rstd2, residual=True)

    o_final = o[:n_nodes]
    node_counts = jnp.maximum(
        jax.ops.segment_sum(jnp.ones((n_nodes,), jnp.float32), batch, num_segments=g), 1.0)
    pooled = jax.ops.segment_sum(o_final, batch, num_segments=g) / node_counts[:, None]
    glob = jnp.concatenate([pooled, o[n_nodes:]], axis=1)
    return o_final, glob


if __name__ == "__main__":
    x_dim, e_dim, g_dim = 8, 4, 6
    num_emb, num_heads, num_layers = 32, 2, 2

    # small 2-graph batch: graph 0 has nodes {0,1,2}, graph 1 has nodes {3,4,5,6}
    edge_index = jnp.array([[0, 1, 1, 2, 3, 4, 4, 5, 5, 6],
                            [1, 0, 2, 1, 4, 3, 5, 4, 6, 5]], dtype=jnp.int32)
    batch = jnp.array([0, 0, 0, 1, 1, 1, 1], dtype=jnp.int32)
    num_graphs = 2
    num_nodes = 7
    num_edges = edge_index.shape[1]

    key = jax.random.PRNGKey(0)
    kx, ke, kc, kp = jax.random.split(key, 4)
    node_x = jax.random.normal(kx, (num_nodes, x_dim), jnp.float32)
    edge_attr = jax.random.normal(ke, (num_edges, e_dim), jnp.float32)
    cond = jax.random.normal(kc, (num_graphs, g_dim), jnp.float32)

    params = init_graph_transformer_params(kp, x_dim, e_dim, g_dim,
                                           num_emb, num_layers, num_heads)

    node_emb, graph_emb = graph_transformer_forward(
        params, node_x, edge_attr, cond, edge_index, batch,
        num_graphs, num_emb, num_heads)
    jax.block_until_ready((node_emb, graph_emb))

    assert node_emb.shape == (num_nodes, num_emb)
    assert graph_emb.shape == (num_graphs, num_emb * 2)
    assert bool(jnp.all(jnp.isfinite(node_emb))) and bool(jnp.all(jnp.isfinite(graph_emb)))
    print("KERNEL_OK")
</pallas_src>

<mosaic_0001>
module attributes {stable_mosaic.version = 11 : i64} {
  func.func @_mlp_kernel(%arg0: i32, %arg1: memref<8x8xbf16, #tpu.memory_space<vmem>>, %arg2: memref<8x32xbf16, #tpu.memory_space<vmem>>, %arg3: memref<1x32xf32, #tpu.memory_space<vmem>>, %arg4: memref<32x32xbf16, #tpu.memory_space<vmem>>, %arg5: memref<1x32xf32, #tpu.memory_space<vmem>>, %arg6: memref<32x32xbf16, #tpu.memory_space<vmem>>, %arg7: memref<1x32xf32, #tpu.memory_space<vmem>>, %arg8: memref<8x32xf32, #tpu.memory_space<vmem>>) attributes {dimension_semantics = [#tpu.dimension_semantics<parallel>], iteration_bounds = array<i64: 1>, scalar_prefetch = 0 : i64, scratch_operands = 0 : i64, tpu.core_type = #tpu.core_type<tc>, window_params = [{transform_indices = @transform_0, window_bounds = array<i64: 8, 8>}, {pipeline_mode = #tpu.pipeline_mode<synchronous>, transform_indices = @transform_1, window_bounds = array<i64: 8, 32>}, {pipeline_mode = #tpu.pipeline_mode<synchronous>, transform_indices = @transform_2, window_bounds = array<i64: 1, 32>}, {pipeline_mode = #tpu.pipeline_mode<synchronous>, transform_indices = @transform_3, window_bounds = array<i64: 32, 32>}, {pipeline_mode = #tpu.pipeline_mode<synchronous>, transform_indices = @transform_4, window_bounds = array<i64: 1, 32>}, {pipeline_mode = #tpu.pipeline_mode<synchronous>, transform_indices = @transform_5, window_bounds = array<i64: 32, 32>}, {pipeline_mode = #tpu.pipeline_mode<synchronous>, transform_indices = @transform_6, window_bounds = array<i64: 1, 32>}, {transform_indices = @transform_7, window_bounds = array<i64: 8, 32>}]} {
    %c0 = arith.constant 0 : index
    %c0_0 = arith.constant 0 : index
    %0 = vector.load %arg1[%c0, %c0_0] : memref<8x8xbf16, #tpu.memory_space<vmem>>, vector<8x8xbf16>
    %c0_1 = arith.constant 0 : index
    %c0_2 = arith.constant 0 : index
    %1 = vector.load %arg2[%c0_1, %c0_2] : memref<8x32xbf16, #tpu.memory_space<vmem>>, vector<8x32xbf16>
    %c0_3 = arith.constant 0 : index
    %c0_4 = arith.constant 0 : index
    %2 = vector.load %arg3[%c0_3, %c0_4] : memref<1x32xf32, #tpu.memory_space<vmem>>, vector<1x32xf32>
    %cst = arith.constant dense<0.000000e+00> : vector<8x32xf32>
    %3 = tpu.matmul %0, %1, %cst {dimension_numbers = #tpu.dot_dimension_numbers<[1], [0], [0], [1], [0, 0, 1, 1], [], []>} : vector<8x8xbf16>, vector<8x32xbf16>, vector<8x32xf32> -> vector<8x32xf32>
    %4 = vector.broadcast %2 : vector<1x32xf32> to vector<8x32xf32>
    %5 = arith.addf %3, %4 : vector<8x32xf32>
    %cst_5 = arith.constant 0.000000e+00 : f32
    %6 = vector.broadcast %cst_5 : f32 to vector<8x32xf32>
    %7 = arith.cmpf oge, %5, %6 : vector<8x32xf32>
    %cst_6 = arith.constant 0.00999999977 : f32
    %8 = vector.broadcast %cst_6 : f32 to vector<8x32xf32>
    %9 = arith.mulf %8, %5 : vector<8x32xf32>
    %10 = arith.select %7, %5, %9 : vector<8x32xi1>, vector<8x32xf32>
    %c0_7 = arith.constant 0 : index
    %c0_8 = arith.constant 0 : index
    %11 = vector.load %arg4[%c0_7, %c0_8] : memref<32x32xbf16, #tpu.memory_space<vmem>>, vector<32x32xbf16>
    %c0_9 = arith.constant 0 : index
    %c0_10 = arith.constant 0 : index
    %12 = vector.load %arg5[%c0_9, %c0_10] : memref<1x32xf32, #tpu.memory_space<vmem>>, vector<1x32xf32>
    %13 = arith.truncf %10 : vector<8x32xf32> to vector<8x32xbf16>
    %cst_11 = arith.constant dense<0.000000e+00> : vector<8x32xf32>
    %14 = tpu.matmul %13, %11, %cst_11 {dimension_numbers = #tpu.dot_dimension_numbers<[1], [0], [0], [1], [0, 0, 1, 1], [], []>} : vector<8x32xbf16>, vector<32x32xbf16>, vector<8x32xf32> -> vector<8x32xf32>
    %15 = vector.broadcast %12 : vector<1x32xf32> to vector<8x32xf32>
    %16 = arith.addf %14, %15 : vector<8x32xf32>
    %cst_12 = arith.constant 0.000000e+00 : f32
    %17 = vector.broadcast %cst_12 : f32 to vector<8x32xf32>
    %18 = arith.cmpf oge, %16, %17 : vector<8x32xf32>
    %cst_13 = arith.constant 0.00999999977 : f32
    %19 = vector.broadcast %cst_13 : f32 to vector<8x32xf32>
    %20 = arith.mulf %19, %16 : vector<8x32xf32>
    %21 = arith.select %18, %16, %20 : vector<8x32xi1>, vector<8x32xf32>
    %c0_14 = arith.constant 0 : index
    %c0_15 = arith.constant 0 : index
    %22 = vector.load %arg6[%c0_14, %c0_15] : memref<32x32xbf16, #tpu.memory_space<vmem>>, vector<32x32xbf16>
    %c0_16 = arith.constant 0 : index
    %c0_17 = arith.constant 0 : index
    %23 = vector.load %arg7[%c0_16, %c0_17] : memref<1x32xf32, #tpu.memory_space<vmem>>, vector<1x32xf32>
    %24 = arith.truncf %21 : vector<8x32xf32> to vector<8x32xbf16>
    %cst_18 = arith.constant dense<0.000000e+00> : vector<8x32xf32>
    %25 = tpu.matmul %24, %22, %cst_18 {dimension_numbers = #tpu.dot_dimension_numbers<[1], [0], [0], [1], [0, 0, 1, 1], [], []>} : vector<8x32xbf16>, vector<32x32xbf16>, vector<8x32xf32> -> vector<8x32xf32>
    %26 = vector.broadcast %23 : vector<1x32xf32> to vector<8x32xf32>
    %27 = arith.addf %25, %26 : vector<8x32xf32>
    %c0_19 = arith.constant 0 : index
    %c0_20 = arith.constant 0 : index
    %28 = vector.load %arg8[%c0_19, %c0_20] : memref<8x32xf32, #tpu.memory_space<vmem>>, vector<8x32xf32>
    tpu.vector_store %arg8[%c0_19, %c0_20], %27 {strides = array<i32>} : memref<8x32xf32, #tpu.memory_space<vmem>>, vector<8x32xf32>,
    return
  }
  func.func @transform_0(%arg0: i32) -> (i32, i32) {
    %c0_i32 = arith.constant 0 : i32
    %c0_i32_0 = arith.constant 0 : i32
    return %arg0, %c0_i32 : i32, i32
  }
  func.func @transform_1(%arg0: i32) -> (i32, i32) {
    %c0_i32 = arith.constant 0 : i32
    %c0_i32_0 = arith.constant 0 : i32
    %c0_i32_1 = arith.constant 0 : i32
    return %c0_i32, %c0_i32_0 : i32, i32
  }
  func.func @transform_2(%arg0: i32) -> (i32, i32) {
    %c0_i32 = arith.constant 0 : i32
    %c0_i32_0 = arith.constant 0 : i32
    %c0_i32_1 = arith.constant 0 : i32
    return %c0_i32, %c0_i32_0 : i32, i32
  }
  func.func @transform_3(%arg0: i32) -> (i32, i32) {
    %c0_i32 = arith.constant 0 : i32
    %c0_i32_0 = arith.constant 0 : i32
    %c0_i32_1 = arith.constant 0 : i32
    return %c0_i32, %c0_i32_0 : i32, i32
  }
  func.func @transform_4(%arg0: i32) -> (i32, i32) {
    %c0_i32 = arith.constant 0 : i32
    %c0_i32_0 = arith.constant 0 : i32
    %c0_i32_1 = arith.constant 0 : i32
    return %c0_i32, %c0_i32_0 : i32, i32
  }
  func.func @transform_5(%arg0: i32) -> (i32, i32) {
    %c0_i32 = arith.constant 0 : i32
    %c0_i32_0 = arith.constant 0 : i32
    %c0_i32_1 = arith.constant 0 : i32
    return %c0_i32, %c0_i32_0 : i32, i32
  }
  func.func @transform_6(%arg0: i32) -> (i32, i32) {
    %c0_i32 = arith.constant 0 : i32
    %c0_i32_0 = arith.constant 0 : i32
    %c0_i32_1 = arith.constant 0 : i32
    return %c0_i32, %c0_i32_0 : i32, i32
  }
  func.func @transform_7(%arg0: i32) -> (i32, i32) {
    %c0_i32 = arith.constant 0 : i32
    %c0_i32_0 = arith.constant 0 : i32
    return %arg0, %c0_i32 : i32, i32
  }
}

</mosaic_0001>

<bundles_post_ra>
// kernel: tpu_custom_call.1
= control target key start
LH: loop header
LB: loop body
LE: loop exit
PB: predicated region body
PF: predicated region fallthrough
CT: control target
= control target key end

     0   :  { %12 = vsyncpa [#allocation3], 0  ;;  %s540_s0 = inlined_call_operand.hbm [shape: bf16[8,8], index: 0, kind: input, shape index: {}]   ;;  %s541_s1 = inlined_call_operand.hbm [shape: bf16[8,32], index: 1, kind: input, shape index: {}]   ;;  %s542_s2 = inlined_call_operand.vmem [shape: f32[1,32], index: 2, kind: input, shape index: {}]   ;;  %s543_s3 = inlined_call_operand.hbm [shape: bf16[32,32], index: 3, kind: input, shape index: {}]   ;;  %s544_s4 = inlined_call_operand.vmem [shape: f32[1,32], index: 4, kind: input, shape index: {}]   ;;  %s545_s5 = inlined_call_operand.vmem [shape: bf16[32,32], index: 5, kind: input, shape index: {}]   ;;  %s546_s6 = inlined_call_operand.vmem [shape: f32[1,32], index: 6, kind: input, shape index: {}]   ;;  %s547_s7 = inlined_call_operand.hbm [shape: f32[8,32], index: 7, kind: output, shape index: {}]  }
   0x1   :  { %13 = vsyncpa [#allocation6], 0 }
   0x2   :  { %14 = vsyncpa [#allocation4], 0  ;;  %s426_s24 = smov [#allocation5]   ;;  %s427_s26 = smov [#allocation2]  }
   0x3   :  { %s31_s25 = sshll.u32 %s426_s24, 4  ;;  %s21_s27 = sshll.u32 %s427_s26, 4  ;;  %s32_s25 = int_to_ptr.vmem [resolvable:$true] %s31_s25  ;;  %s22_s27 = int_to_ptr.vmem [resolvable:$true] %s21_s27 }
   0x4   :  { %s332_s30 = scalar_lea.hbm %s541_s1, 64 }
   0x5   :  { %p333_p0 = scmp.ne.s32.totalorder %s541_s1, %s332_s30  ;;  %p336_p1 = scmp.lt.u32.totalorder %s332_s30, %s541_s1 }
   0x7   :  { %p338_p2 = pnand %p336_p1, %p333_p0 }
   0x9   :  { %341 = shalt.err (!%p338_p2)
}
   0xa   :  { %s342_s12 = scalar_lea.vmem %s32_s25, 64  ;;  %p347_p4 = scmp.lt.s32.totalorder %s32_s25, %s32_s25 }
   0xb   :  { %p343_p3 = scmp.ne.s32.totalorder %s32_s25, %s342_s12  ;;  %p348_p5 = scmp.lt.s32.totalorder %s342_s12, %s342_s12 }
   0xd   :  { %p349_p6 = por %p348_p5, %p347_p4 }
   0xf   :  { %p350_p7 = pnand %p349_p6, %p343_p3 }
  0x11   :  { %353 = shalt.err (!%p350_p7)
}
  0x12   :  { %34 = dma.hbm_to_vmem [thread:$0]  %s541_s1, 64, %s32_s25, [#allocation6]  }
  0x13   :  { %s354_s17 = scalar_lea.hbm %s540_s0, 64 }
  0x14   :  { %p355_p8 = scmp.ne.s32.totalorder %s540_s0, %s354_s17  ;;  %p358_p9 = scmp.lt.u32.totalorder %s354_s17, %s540_s0 }
  0x16   :  { %p360_p10 = pnand %p358_p9, %p355_p8 }
  0x18   :  { %363 = shalt.err (!%p360_p10)
}
  0x19   :  { %s364_s22 = scalar_lea.vmem %s22_s27, 64  ;;  %p369_p12 = scmp.lt.s32.totalorder %s22_s27, %s22_s27 }
  0x1a   :  { %p365_p11 = scmp.ne.s32.totalorder %s22_s27, %s364_s22  ;;  %p370_p13 = scmp.lt.s32.totalorder %s364_s22, %s364_s22 }
  0x1c   :  { %p371_p0 = por %p370_p13, %p369_p12 }
  0x1e   :  { %p372_p1 = pnand %p371_p0, %p365_p11 }
  0x20   :  { %375 = shalt.err (!%p372_p1)
}
  0x21   :  { %24 = dma.hbm_to_vmem [thread:$0]  %s540_s0, 64, %s22_s27, [#allocation3]  }
  0x22   :  { %s428_s24 = smov [#allocation7]   ;;  %s376_s29 = scalar_lea.hbm %s543_s3, 256 }
  0x23   :  { %s42_s25 = sshll.u32 %s428_s24, 4  ;;  %p377_p2 = scmp.ne.s32.totalorder %s543_s3, %s376_s29  ;;  %s43_s25 = int_to_ptr.vmem [resolvable:$true] %s42_s25 }
  0x24   :  { %p380_p3 = scmp.lt.u32.totalorder %s376_s29, %s543_s3 }
  0x26   :  { %p382_p4 = pnand %p380_p3, %p377_p2 }
  0x28   :  { %385 = shalt.err (!%p382_p4)
}
  0x29   :  { %s386_s11 = scalar_lea.vmem %s43_s25, 256  ;;  %p391_p6 = scmp.lt.s32.totalorder %s43_s25, %s43_s25 }
  0x2a   :  { %p387_p5 = scmp.ne.s32.totalorder %s43_s25, %s386_s11  ;;  %p392_p7 = scmp.lt.s32.totalorder %s386_s11, %s386_s11 }
  0x2c   :  { %p393_p8 = por %p392_p7, %p391_p6 }
  0x2e   :  { %p394_p9 = pnand %p393_p8, %p387_p5 }
  0x30   :  { %397 = shalt.err (!%p394_p9)
}
  0x31   :  { %s429_s0 = smov 64   ;;  %s430_s27 = smov 4  }
  0x32   :  { %48 = dma.hbm_to_vmem [thread:$0]  %s543_s3, 256, %s43_s25, [#allocation6], %s429_s0, %s429_s0, %s430_s27  }
  0x33   :  { %420 = dma.done.wait [#allocation3], 64  }
  0x34   :  { %421 = vsyncadd [#allocation3], 4294967232 }
  0x35   :  { %422 = dma.done.wait [#allocation6], 320  }
  0x36   :  { %423 = vsyncadd [#allocation6], 4294966976  ;;  %v431_v0 = vmov 0.0   ;;  %vm432_vm0 = vmmov 0   ;;  %vm78_vm1 = vcmask 1043456   ;;  %vm74_vm2 = vcmask 64512  }
  0x37   :  { %298 = vmatprep.subr.bf16.mxu0 %v431_v0  ;;  %300 = vmatprep.mubr.msk.bf16.mxu0 %vm432_vm0, %v431_v0  ;;  %v66_v1 = vld [vmem:[#allocation5] sm:$0xf]  ;;  %v65_v2 = vld [vmem:[#allocation2] sm:$0xf]  ;;  %v328_v4 = vld [vmem:[#allocation7] sm:$0xff]   ;;  %vm149_vm4 = vcmask 261120  }
  0x38   :  { %304 = vmatprep.subr.bf16.mxu1 %v431_v0  ;;  %308 = vmatprep.mubr.msk.bf16.mxu1 %vm432_vm0, %v431_v0  ;;  %v80_v3 = vsel %vm78_vm1, %v66_v1, 0  ;;  %v329_v5 = vld [vmem:[#allocation7 + $0x8] sm:$0xff]   ;;  %v331_v16 = vld [vmem:[%s545_s5 + $0x8] sm:$0xff]  }
  0x39   :  { %299 = vmatpush3.bf16.msra.mxu0 %v80_v3  ;;  %305 = vmatpush3.bf16.msra.mxu1 %v328_v4  ;;  %v280_v6 = vld [vmem:[%s542_s2] ss:$0 sm:$0xff] }
  0x3a   :  { %312 = vmatprep.subr.bf16.mxu0 %v431_v0  ;;  %306 = vmatprep.subr.bf16.mxu1 %v431_v0  ;;  %v330_v15 = vld [vmem:[%s545_s5] sm:$0xff]   ;;  %s433_s5 = smov [#allocation8]  }
  0x3b   :  { %v282_v17 = vld [vmem:[%s544_s4] ss:$0 sm:$0xff]  ;;  %s270_s22 = sshll.u32 %s433_s5, 4  ;;  %s271_s22 = int_to_ptr.vmem [resolvable:$true] %s270_s22 }
  0x3c   :  { %301 = vmatmul.mubr.msk.bf16.vlgmr.msra.gmra.mrb[0].mxu0 %vm74_vm2, %v65_v2  ;;  %v286_v26 = vld [vmem:[%s546_s6] ss:$0 sm:$0xff]  ;;  %s398_s4 = scalar_lea.vmem %s271_s22, 128  ;;  %p403_p11 = scmp.lt.s32.totalorder %s271_s22, %s271_s22 }
  0x3d   :  { %316 = vmatprep.mubr.msk.bf16.mxu0 %vm432_vm0, %v431_v0  ;;  %307 = vmatpush3.bf16.msra.mxu1 %v329_v5  ;;  %p399_p10 = scmp.ne.s32.totalorder %s271_s22, %s398_s4  ;;  %p404_p12 = scmp.lt.s32.totalorder %s398_s4, %s398_s4 }
  0x3e   :  { %313 = vmatpush3.bf16.msra.mxu0 %v330_v15 }
  0x3f   :  { %314 = vmatprep.subr.bf16.mxu0 %v431_v0  ;;  %p405_p13 = por %p404_p12, %p403_p11 }
  0x41   :  { %p406_p0 = pnand %p405_p13, %p399_p10 }
  0x42   :  { %315 = vmatpush3.bf16.msra.mxu0 %v331_v16 }
 0x10f   :  { %v116_v7 = vpop.f32.mrb[0].mxu0 }
 0x110   :  { %v117_v8 = vadd.f32 %v280_v6, %v116_v7  ;;  %v302_v9 = vpop.f32.mrb[1].mxu0 }
 0x111   :  { %v119_v10 = vpop.f32.mrb[2].mxu0 }
 0x112   :  { %vm122_vm3 = vcmp.ge.f32.partialorder %v117_v8, 0.0  ;;  %v123_v11 = vmul.f32 0.01, %v117_v8  ;;  %v303_v12 = vpop.f32.mrb[3].mxu0 }
 0x114   :  { %v124_v13 = vsel %vm122_vm3, %v117_v8, %v123_v11 }
 0x115   :  { %v130_v14 = vpack.c.bf16 %v124_v13, %v124_v13 }
 0x117   :  { %309 = vmatmul.mubr.msk.bf16.vlgmr.msra.gmra.mrb[0].mxu1 %vm149_vm4, %v130_v14 }
 0x1ea   :  { %v187_v18 = vpop.f32.mrb[0].mxu1 }
 0x1eb   :  { %v188_v19 = vadd.f32 %v282_v17, %v187_v18  ;;  %v310_v20 = vpop.f32.mrb[1].mxu1 }
 0x1ec   :  { %v190_v21 = vpop.f32.mrb[2].mxu1 }
 0x1ed   :  { %vm193_vm5 = vcmp.ge.f32.partialorder %v188_v19, 0.0  ;;  %v194_v22 = vmul.f32 0.01, %v188_v19  ;;  %v311_v23 = vpop.f32.mrb[3].mxu1 }
 0x1ef   :  { %v195_v24 = vsel %vm193_vm5, %v188_v19, %v194_v22 }
 0x1f0   :  { %v201_v25 = vpack.c.bf16 %v195_v24, %v195_v24 }
 0x1f2   :  { %317 = vmatmul.mubr.msk.bf16.vlgmr.msra.gmra.mrb[4].mxu0 %vm149_vm4, %v201_v25 }
 0x2c5   :  { %v257_v27 = vpop.f32.mrb[4].mxu0 }
 0x2c6   :  { %v258_v28 = vadd.f32 %v286_v26, %v257_v27  ;;  %v318_v29 = vpop.f32.mrb[5].mxu0 }
 0x2c7   :  { %v260_v30 = vpop.f32.mrb[6].mxu0 }
 0x2c8   :  { %263 = vst.msk [vmem:[#allocation8] sm:$0xff] %vm149_vm4, %v258_v28  ;;  %v319_v31 = vpop.f32.mrb[7].mxu0 }
 0x2c9   :  { %409 = shalt.err (!%p406_p0)
}
 0x2ca   :  { %s410_s6 = scalar_lea.hbm %s547_s7, 128 }
 0x2cb   :  { %p411_p1 = scmp.ne.s32.totalorder %s547_s7, %s410_s6  ;;  %p414_p2 = scmp.lt.u32.totalorder %s410_s6, %s547_s7 }
 0x2cd   :  { %p416_p3 = pnand %p414_p2, %p411_p1 }
 0x2cf   :  { %419 = shalt.err (!%p416_p3)
}
 0x2d0   :  { %273 = dma.vmem_to_hbm [thread:$0]  %s271_s22, 128, %s547_s7, [#allocation4]  }
 0x2d1   :  { %424 = dma.done.wait [#allocation4], 128  }
 0x2d2   :  { %425 = vsyncadd [#allocation4], 4294967168 }
 0x2d3   :  { %277 = vsyncpa [#allocation3], 1 }
 0x2d4   :  { %278 = vsyncpa [#allocation6], 1 }
 0x2d5   :  { %279 = vsyncpa [#allocation4], 1 }

</bundles_post_ra>
